<compile_context>
chip_gen: v7x
topology: tpu7x:2x2x1
jax: 0.10.0
libtpu: 0.0.40
codegen_flags: <defaults>
</compile_context>

<pallas_src>
import functools

import jax
import jax.numpy as jnp
from jax import lax
from jax.experimental import pallas as pl
from jax.experimental.pallas import tpu as pltpu


def _round_up(x, m):
    return ((x + m - 1) // m) * m


# ----------------------------- Pallas kernel ------------------------------- #
def generator_kernel(idx_ref, ea_ref, pos_ref, batch_oh_ref, inv_cnt_ref,
                     w1s_ref, w1d_ref, w1e_ref, b1_ref,
                     w2p_ref, w2a_ref, b2_ref,
                     out_ref,
                     iota_ref, pw1s_ref, pw1d_ref, agg_ref):
    f32 = jnp.float32
    bf16 = jnp.bfloat16
    step = pl.program_id(0)
    last = pl.num_programs(0) - 1
    n = pos_ref.shape[0]
    te = idx_ref.shape[1]
    # contraction over dim 0 of both operands (no explicit transposes materialized)
    c0 = (((0,), (0,)), ((), ()))

    # ---- one-time init (hoisted out of the edge loop) ----
    @pl.when(step == 0)
    def _init():
        pos = pos_ref[...]                                        # [N, D]
        # b1 is folded into the src gather table: real edges' one-hot columns sum
        # to 1; padded edges are killed by their all-zero dst column anyway.
        pw1s_ref[...] = (jnp.dot(pos, w1s_ref[...], preferred_element_type=f32)
                         + b1_ref[...]).astype(bf16)              # [N, H]
        pw1d_ref[...] = jnp.dot(pos, w1d_ref[...],
                                preferred_element_type=f32).astype(bf16)
        agg_ref[...] = jnp.zeros_like(agg_ref)
        # loop-invariant node iota cached once (JAX does not CSE broadcasts).
        iota_ref[...] = lax.broadcasted_iota(jnp.int32, (n, te), 0)

    # ---- per-edge-tile message + scatter-add (lane-major [*, TE] blocks) ----
    # One-hots built in-register as bf16 from the streamed int32 indices; padded
    # edges carry the sentinel index == n -> all-zero columns, contribute nothing.
    node_iota = iota_ref[...]                                     # [N, TE]
    src_oh = (idx_ref[0:1, :] == node_iota).astype(bf16)          # [N, TE]
    dst_oh = (idx_ref[1:2, :] == node_iota).astype(bf16)          # [N, TE]

    # edge message MLP: relu((pos@W1s + b1)[src] + (pos@W1d)[dst] + ea @ W1e)
    pre = (lax.dot_general(src_oh, pw1s_ref[...], c0,
                           preferred_element_type=f32)
           + lax.dot_general(dst_oh, pw1d_ref[...], c0,
                             preferred_element_type=f32)
           + lax.dot_general(ea_ref[...], w1e_ref[...], c0,
                             preferred_element_type=f32))         # [TE, H]
    # NOTE: bf16 msg / bf16 gather tables are the dominant error source vs the
    # f32 reference (grows with in-degree); acceptable at the 2e-2 tolerance.
    msg = jnp.maximum(pre, 0.0).astype(bf16)

    # scatter-add messages to destination nodes: [N,TE] @ [TE,H], f32 accumulate.
    agg_ref[...] += jnp.dot(dst_oh, msg, preferred_element_type=f32)  # [N, H]

    # ---- finalize: node-update MLP + per-graph mean centering ----
    @pl.when(step == last)
    def _finalize():
        pos = pos_ref[...]
        raw = (jnp.dot(pos, w2p_ref[...], preferred_element_type=f32)
               + jnp.dot(agg_ref[...], w2a_ref[...], preferred_element_type=f32)
               + b2_ref[...])                                     # [N, Dp]
        boh = batch_oh_ref[...].astype(f32)                       # [B, N] (0/1 exact)
        mean = (jnp.dot(boh, raw, preferred_element_type=f32)
                * inv_cnt_ref[...])                               # [B, Dp]
        out_ref[...] = raw - lax.dot_general(
            boh, mean, c0, preferred_element_type=f32)            # [N, Dp]


# ------------------------------- wrapper ------------------------------------ #
@functools.partial(jax.jit, static_argnames=("num_graphs", "edge_tile"))
def generator_data_adaptor_forward(pos, aggr_index, aggr_attr, aggr_weight,
                                   batch, params, *, num_graphs, edge_tile=256):
    """Replicates GeneratorDataAdaptor.forward on a synthetic generator."""
    f32 = jnp.float32
    bf16 = jnp.bfloat16
    n, d = pos.shape
    e = aggr_index.shape[1]
    h = params["w1s"].shape[1]

    # Lane-major edge streams want lane-multiple tiles.  Sweep per generation:
    # 128-256 on v5e / large N, 512-1024 when N is small.
    assert edge_tile % 128 == 0
    edge_tile = min(edge_tile, _round_up(e, 128))

    # --- adaptor glue: edge_attr = cat([aggr_attr, aggr_weight.unsqueeze(1)], 1)
    edge_attr = jnp.concatenate(
        [aggr_attr, aggr_weight[:, None]], axis=1).astype(f32)    # [E, F]
    f = edge_attr.shape[1]

    # --- pad feature dims to 128 lanes (lane-dense MXU tiles / stores); padded
    #     columns stay exactly zero and are sliced off at the end.
    h_pad = _round_up(h, 128)
    d_pad = _round_up(d, 128)
    w1s = jnp.pad(params["w1s"].astype(f32), ((0, 0), (0, h_pad - h)))
    w1d = jnp.pad(params["w1d"].astype(f32), ((0, 0), (0, h_pad - h)))
    w1e = jnp.pad(params["w1e"].astype(f32), ((0, 0), (0, h_pad - h))).astype(bf16)
    b1 = jnp.pad(params["b1"].astype(f32), ((0, 0), (0, h_pad - h)))
    w2p = jnp.pad(params["w2p"].astype(f32), ((0, 0), (0, d_pad - d)))
    w2a = jnp.pad(params["w2a"].astype(f32), ((0, h_pad - h), (0, d_pad - d)))
    b2 = jnp.pad(params["b2"].astype(f32), ((0, 0), (0, d_pad - d)))

    # --- lane-major edge streams, padded to whole tiles; sentinel index == n
    #     marks dummy edges (their one-hot columns are all zero inside the kernel).
    e_pad = _round_up(e, edge_tile)
    idx_p = jnp.pad(aggr_index.astype(jnp.int32), ((0, 0), (0, e_pad - e)),
                    constant_values=n)                            # [2, Ep]
    ea_p = jnp.pad(edge_attr.T, ((0, 0), (0, e_pad - e))).astype(bf16)  # [F, Ep]
    num_edge_tiles = e_pad // edge_tile

    # --- per-graph pooling helpers (B x N, tiny compared to E x N)
    batch_oh_f = jax.nn.one_hot(batch, num_graphs, dtype=f32)     # [N, B]
    inv_cnt = (1.0 / jnp.maximum(
        batch_oh_f.sum(axis=0, keepdims=True), 1.0)).T            # [B, 1]
    batch_oh = batch_oh_f.T.astype(bf16)                          # [B, N]

    pos_f = pos.astype(f32)

    # --- VMEM budget: keep the total <= 48 MiB so the kernel also fits v7x's
    #     64 MiB physical VMEM (v5e/v6e have 128 MiB and could go higher).
    vmem_cap = 48 * (1 << 20)
    est = (n * h_pad * (2 + 2 + 4)                  # pw1s/pw1d (bf16) + agg (f32)
           + n * edge_tile * 4                      # cached node iota (int32)
           + 2 * n * d_pad * 4                      # resident output block
           + 2 * (2 * edge_tile * 4 + f * edge_tile * 2)  # streamed idx/attr (x2 buf)
           + n * d * 4 + num_graphs * (2 * n + 4)   # pos, batch one-hot, 1/count
           + (2 * d * h_pad + h_pad + d * d_pad + h_pad * d_pad + d_pad) * 4
           + f * h_pad * 2)                         # weights (w1e bf16)
    assert est <= vmem_cap, (
        f"estimated VMEM {est} B exceeds {vmem_cap} B; shrink N or edge_tile "
        f"(node tiling not implemented)")

    single = pl.Buffered(1)        # grid-invariant inputs: no double-buffering
    inv = lambda i: (0, 0)

    new_pos_padded = pl.pallas_call(
        generator_kernel,
        out_shape=jax.ShapeDtypeStruct((n, d_pad), f32),
        grid=(num_edge_tiles,),
        in_specs=[
            pl.BlockSpec((2, edge_tile), lambda i: (0, i)),       # edge indices
            pl.BlockSpec((f, edge_tile), lambda i: (0, i)),       # edge_attr (bf16)
            pl.BlockSpec((n, d), inv, pipeline_mode=single),      # pos
            pl.BlockSpec((num_graphs, n), inv, pipeline_mode=single),   # batch oh
            pl.BlockSpec((num_graphs, 1), inv, pipeline_mode=single),   # 1/count
            pl.BlockSpec((d, h_pad), inv, pipeline_mode=single),  # w1s
            pl.BlockSpec((d, h_pad), inv, pipeline_mode=single),  # w1d
            pl.BlockSpec((f, h_pad), inv, pipeline_mode=single),  # w1e (bf16)
            pl.BlockSpec((1, h_pad), inv, pipeline_mode=single),  # b1
            pl.BlockSpec((d, d_pad), inv, pipeline_mode=single),  # w2p
            pl.BlockSpec((h_pad, d_pad), inv, pipeline_mode=single),    # w2a
            pl.BlockSpec((1, d_pad), inv, pipeline_mode=single),  # b2
        ],
        out_specs=pl.BlockSpec((n, d_pad), inv),
        scratch_shapes=[
            pltpu.VMEM((n, edge_tile), jnp.int32),                # cached node iota
            pltpu.VMEM((n, h_pad), bf16),                         # pos @ w1s + b1
            pltpu.VMEM((n, h_pad), bf16),                         # pos @ w1d
            pltpu.VMEM((n, h_pad), f32),                          # scatter accum
        ],
        compiler_params=pltpu.CompilerParams(
            dimension_semantics=("arbitrary",),                   # edge reduction
            vmem_limit_bytes=vmem_cap),
    )(idx_p, ea_p, pos_f, batch_oh, inv_cnt,
      w1s, w1d, w1e, b1, w2p, w2a, b2)

    # TODO(synk): GraphStruct is an opaque container; `layout(pos)` just swaps
    # the pos field, so we return the new positions directly.
    return new_pos_padded[:, :d]


# ------------------------------ reference ----------------------------------- #
def _reference_forward(pos, aggr_index, aggr_attr, aggr_weight, batch, params,
                       num_graphs):
    edge_attr = jnp.concatenate([aggr_attr, aggr_weight[:, None]], axis=1)
    ps = pos[aggr_index[0]]
    pd = pos[aggr_index[1]]
    msg = jax.nn.relu(ps @ params["w1s"] + pd @ params["w1d"]
                      + edge_attr @ params["w1e"] + params["b1"])
    agg = jnp.zeros((pos.shape[0], msg.shape[1]), jnp.float32).at[
        aggr_index[1]].add(msg)
    raw = pos @ params["w2p"] + agg @ params["w2a"] + params["b2"]
    mean = jnp.zeros((num_graphs, raw.shape[1]), jnp.float32).at[batch].add(raw)
    cnt = jnp.zeros((num_graphs, 1), jnp.float32).at[batch].add(1.0)
    return raw - (mean / jnp.maximum(cnt, 1.0))[batch]


if __name__ == "__main__":
    # small, module-consistent shapes; E non-multiple of the edge tile exercises
    # the sentinel-padding path; edge_tile=128 -> 2 pipelined grid steps.
    N, E, D, F_ATTR, H, B = 64, 250, 4, 3, 32, 2

    key = jax.random.PRNGKey(0)
    (k_pos, k_src, k_dst, k_attr, k_w,
     k1, k2, k3, k4, k5, k6, k7) = jax.random.split(key, 12)

    pos = jax.random.normal(k_pos, (N, D), jnp.float32)
    aggr_index = jnp.stack([
        jax.random.randint(k_src, (E,), 0, N),
        jax.random.randint(k_dst, (E,), 0, N)]).astype(jnp.int32)      # [2, E]
    aggr_attr = jax.random.normal(k_attr, (E, F_ATTR), jnp.float32)
    aggr_weight = jax.random.uniform(k_w, (E,), jnp.float32)
    batch = jnp.concatenate([jnp.zeros(N // 2, jnp.int32),
                             jnp.ones(N - N // 2, jnp.int32)])          # [N]

    # deterministic synthetic generator parameters (nonzero biases exercise the
    # b1-folding path)
    params = {
        "w1s": 0.1 * jax.random.normal(k1, (D, H), jnp.float32),
        "w1d": 0.1 * jax.random.normal(k2, (D, H), jnp.float32),
        "w1e": 0.1 * jax.random.normal(k3, (F_ATTR + 1, H), jnp.float32),
        "b1": 0.05 * jax.random.normal(k6, (1, H), jnp.float32),
        "w2p": 0.1 * jax.random.normal(k4, (D, D), jnp.float32),
        "w2a": 0.1 * jax.random.normal(k5, (H, D), jnp.float32),
        "b2": 0.05 * jax.random.normal(k7, (1, D), jnp.float32),
    }

    out = generator_data_adaptor_forward(
        pos, aggr_index, aggr_attr, aggr_weight, batch, params,
        num_graphs=B, edge_tile=128)
    out = jax.block_until_ready(out)

    ref = _reference_forward(pos, aggr_index, aggr_attr, aggr_weight, batch,
                             params, B)
    assert out.shape == (N, D)
    # bf16 gather tables / messages (f32 accumulation) -> slightly looser tolerance
    assert jnp.allclose(out, ref, rtol=2e-2, atol=2e-2), "mismatch vs JAX reference"
    print("KERNEL_OK")
</pallas_src>

<mosaic_0001>
module attributes {stable_mosaic.version = 11 : i64} {
  func.func @generator_kernel(%arg0: i32, %arg1: memref<2x128xi32, #tpu.memory_space<vmem>>, %arg2: memref<4x128xbf16, #tpu.memory_space<vmem>>, %arg3: memref<64x4xf32, #tpu.memory_space<vmem>>, %arg4: memref<2x64xbf16, #tpu.memory_space<vmem>>, %arg5: memref<2x1xf32, #tpu.memory_space<vmem>>, %arg6: memref<4x128xf32, #tpu.memory_space<vmem>>, %arg7: memref<4x128xf32, #tpu.memory_space<vmem>>, %arg8: memref<4x128xbf16, #tpu.memory_space<vmem>>, %arg9: memref<1x128xf32, #tpu.memory_space<vmem>>, %arg10: memref<4x128xf32, #tpu.memory_space<vmem>>, %arg11: memref<128x128xf32, #tpu.memory_space<vmem>>, %arg12: memref<1x128xf32, #tpu.memory_space<vmem>>, %arg13: memref<64x128xf32, #tpu.memory_space<vmem>>, %arg14: memref<64x128xi32, #tpu.memory_space<vmem>>, %arg15: memref<64x128xbf16, #tpu.memory_space<vmem>>, %arg16: memref<64x128xbf16, #tpu.memory_space<vmem>>, %arg17: memref<64x128xf32, #tpu.memory_space<vmem>>) attributes {dimension_semantics = [#tpu.dimension_semantics<arbitrary>], iteration_bounds = array<i64: 2>, scalar_prefetch = 0 : i64, scratch_operands = 4 : i64, tpu.core_type = #tpu.core_type<tc>, window_params = [{transform_indices = @transform_0, window_bounds = array<i64: 2, 128>}, {transform_indices = @transform_1, window_bounds = array<i64: 4, 128>}, {pipeline_mode = #tpu.pipeline_mode<synchronous>, transform_indices = @transform_2, window_bounds = array<i64: 64, 4>}, {pipeline_mode = #tpu.pipeline_mode<synchronous>, transform_indices = @transform_3, window_bounds = array<i64: 2, 64>}, {pipeline_mode = #tpu.pipeline_mode<synchronous>, transform_indices = @transform_4, window_bounds = array<i64: 2, 1>}, {pipeline_mode = #tpu.pipeline_mode<synchronous>, transform_indices = @transform_5, window_bounds = array<i64: 4, 128>}, {pipeline_mode = #tpu.pipeline_mode<synchronous>, transform_indices = @transform_6, window_bounds = array<i64: 4, 128>}, {pipeline_mode = #tpu.pipeline_mode<synchronous>, transform_indices = @transform_7, window_bounds = array<i64: 4, 128>}, {pipeline_mode = #tpu.pipeline_mode<synchronous>, transform_indices = @transform_8, window_bounds = array<i64: 1, 128>}, {pipeline_mode = #tpu.pipeline_mode<synchronous>, transform_indices = @transform_9, window_bounds = array<i64: 4, 128>}, {pipeline_mode = #tpu.pipeline_mode<synchronous>, transform_indices = @transform_10, window_bounds = array<i64: 128, 128>}, {pipeline_mode = #tpu.pipeline_mode<synchronous>, transform_indices = @transform_11, window_bounds = array<i64: 1, 128>}, {pipeline_mode = #tpu.pipeline_mode<synchronous>, transform_indices = @transform_12, window_bounds = array<i64: 64, 128>}]} {
    %c0_i32 = arith.constant 0 : i32
    %0 = arith.cmpi eq, %arg0, %c0_i32 : i32
    %1 = arith.extui %0 : i1 to i32
    %c0_i32_0 = arith.constant 0 : i32
    %2 = arith.cmpi ne, %1, %c0_i32_0 : i32
    scf.if %2 {
      %c0_22 = arith.constant 0 : index
      %c0_23 = arith.constant 0 : index
      %35 = vector.load %arg3[%c0_22, %c0_23] : memref<64x4xf32, #tpu.memory_space<vmem>>, vector<64x4xf32>
      %c0_24 = arith.constant 0 : index
      %c0_25 = arith.constant 0 : index
      %36 = vector.load %arg6[%c0_24, %c0_25] : memref<4x128xf32, #tpu.memory_space<vmem>>, vector<4x128xf32>
      %cst_26 = arith.constant dense<0.000000e+00> : vector<64x128xf32>
      %37 = tpu.matmul %35, %36, %cst_26 {dimension_numbers = #tpu.dot_dimension_numbers<[1], [0], [0], [1], [0, 0, 1, 1], [], []>} : vector<64x4xf32>, vector<4x128xf32>, vector<64x128xf32> -> vector<64x128xf32>
      %c0_27 = arith.constant 0 : index
      %c0_28 = arith.constant 0 : index
      %38 = vector.load %arg9[%c0_27, %c0_28] : memref<1x128xf32, #tpu.memory_space<vmem>>, vector<1x128xf32>
      %39 = vector.broadcast %38 : vector<1x128xf32> to vector<64x128xf32>
      %40 = arith.addf %37, %39 : vector<64x128xf32>
      %41 = arith.truncf %40 : vector<64x128xf32> to vector<64x128xbf16>
      %c0_29 = arith.constant 0 : index
      %c0_30 = arith.constant 0 : index
      %42 = vector.load %arg15[%c0_29, %c0_30] : memref<64x128xbf16, #tpu.memory_space<vmem>>, vector<64x128xbf16>
      tpu.vector_store %arg15[%c0_29, %c0_30], %41 {strides = array<i32>} : memref<64x128xbf16, #tpu.memory_space<vmem>>, vector<64x128xbf16>,
      %c0_31 = arith.constant 0 : index
      %c0_32 = arith.constant 0 : index
      %43 = vector.load %arg7[%c0_31, %c0_32] : memref<4x128xf32, #tpu.memory_space<vmem>>, vector<4x128xf32>
      %cst_33 = arith.constant dense<0.000000e+00> : vector<64x128xf32>
      %44 = tpu.matmul %35, %43, %cst_33 {dimension_numbers = #tpu.dot_dimension_numbers<[1], [0], [0], [1], [0, 0, 1, 1], [], []>} : vector<64x4xf32>, vector<4x128xf32>, vector<64x128xf32> -> vector<64x128xf32>
      %45 = arith.truncf %44 : vector<64x128xf32> to vector<64x128xbf16>
      %c0_34 = arith.constant 0 : index
      %c0_35 = arith.constant 0 : index
      %46 = vector.load %arg16[%c0_34, %c0_35] : memref<64x128xbf16, #tpu.memory_space<vmem>>, vector<64x128xbf16>
      tpu.vector_store %arg16[%c0_34, %c0_35], %45 {strides = array<i32>} : memref<64x128xbf16, #tpu.memory_space<vmem>>, vector<64x128xbf16>,
      %cst_36 = arith.constant 0.000000e+00 : f32
      %47 = vector.broadcast %cst_36 : f32 to vector<64x128xf32>
      %c0_37 = arith.constant 0 : index
      %c0_38 = arith.constant 0 : index
      %48 = vector.load %arg17[%c0_37, %c0_38] : memref<64x128xf32, #tpu.memory_space<vmem>>, vector<64x128xf32>
      tpu.vector_store %arg17[%c0_37, %c0_38], %47 {strides = array<i32>} : memref<64x128xf32, #tpu.memory_space<vmem>>, vector<64x128xf32>,
      %49 = tpu.iota {dimensions = array<i32: 0>} : vector<64x128xi32>
      %c0_39 = arith.constant 0 : index
      %c0_40 = arith.constant 0 : index
      %50 = vector.load %arg14[%c0_39, %c0_40] : memref<64x128xi32, #tpu.memory_space<vmem>>, vector<64x128xi32>
      tpu.vector_store %arg14[%c0_39, %c0_40], %49 {strides = array<i32>} : memref<64x128xi32, #tpu.memory_space<vmem>>, vector<64x128xi32>,
    } else {
    }
    %c0 = arith.constant 0 : index
    %c0_1 = arith.constant 0 : index
    %3 = vector.load %arg14[%c0, %c0_1] : memref<64x128xi32, #tpu.memory_space<vmem>>, vector<64x128xi32>
    %c0_2 = arith.constant 0 : index
    %c0_3 = arith.constant 0 : index
    %4 = vector.load %arg1[%c0_2, %c0_3] : memref<2x128xi32, #tpu.memory_space<vmem>>, vector<1x128xi32>
    %5 = vector.broadcast %4 : vector<1x128xi32> to vector<64x128xi32>
    %6 = arith.cmpi eq, %5, %3 : vector<64x128xi32>
    %7 = arith.extui %6 : vector<64x128xi1> to vector<64x128xi32>
    %8 = arith.sitofp %7 : vector<64x128xi32> to vector<64x128xf32>
    %9 = arith.truncf %8 : vector<64x128xf32> to vector<64x128xbf16>
    %c1 = arith.constant 1 : index
    %c0_4 = arith.constant 0 : index
    %10 = vector.load %arg1[%c1, %c0_4] : memref<2x128xi32, #tpu.memory_space<vmem>>, vector<1x128xi32>
    %11 = vector.broadcast %10 : vector<1x128xi32> to vector<64x128xi32>
    %12 = arith.cmpi eq, %11, %3 : vector<64x128xi32>
    %13 = arith.extui %12 : vector<64x128xi1> to vector<64x128xi32>
    %14 = arith.sitofp %13 : vector<64x128xi32> to vector<64x128xf32>
    %15 = arith.truncf %14 : vector<64x128xf32> to vector<64x128xbf16>
    %c0_5 = arith.constant 0 : index
    %c0_6 = arith.constant 0 : index
    %16 = vector.load %arg15[%c0_5, %c0_6] : memref<64x128xbf16, #tpu.memory_space<vmem>>, vector<64x128xbf16>
    %cst = arith.constant dense<0.000000e+00> : vector<128x128xf32>
    %17 = tpu.matmul %9, %16, %cst {dimension_numbers = #tpu.dot_dimension_numbers<[0], [0], [1], [1], [0, 1, 1, 1], [], []>} : vector<64x128xbf16>, vector<64x128xbf16>, vector<128x128xf32> -> vector<128x128xf32>
    %c0_7 = arith.constant 0 : index
    %c0_8 = arith.constant 0 : index
    %18 = vector.load %arg16[%c0_7, %c0_8] : memref<64x128xbf16, #tpu.memory_space<vmem>>, vector<64x128xbf16>
    %cst_9 = arith.constant dense<0.000000e+00> : vector<128x128xf32>
    %19 = tpu.matmul %15, %18, %cst_9 {dimension_numbers = #tpu.dot_dimension_numbers<[0], [0], [1], [1], [0, 1, 1, 1], [], []>} : vector<64x128xbf16>, vector<64x128xbf16>, vector<128x128xf32> -> vector<128x128xf32>
    %20 = arith.addf %17, %19 : vector<128x128xf32>
    %c0_10 = arith.constant 0 : index
    %c0_11 = arith.constant 0 : index
    %21 = vector.load %arg2[%c0_10, %c0_11] : memref<4x128xbf16, #tpu.memory_space<vmem>>, vector<4x128xbf16>
    %c0_12 = arith.constant 0 : index
    %c0_13 = arith.constant 0 : index
    %22 = vector.load %arg8[%c0_12, %c0_13] : memref<4x128xbf16, #tpu.memory_space<vmem>>, vector<4x128xbf16>
    %cst_14 = arith.constant dense<0.000000e+00> : vector<128x128xf32>
    %23 = tpu.matmul %21, %22, %cst_14 {dimension_numbers = #tpu.dot_dimension_numbers<[0], [0], [1], [1], [0, 1, 1, 1], [], []>} : vector<4x128xbf16>, vector<4x128xbf16>, vector<128x128xf32> -> vector<128x128xf32>
    %24 = arith.addf %20, %23 : vector<128x128xf32>
    %cst_15 = arith.constant 0.000000e+00 : f32
    %25 = vector.broadcast %cst_15 : f32 to vector<128x128xf32>
    %26 = arith.maximumf %24, %25 : vector<128x128xf32>
    %27 = arith.truncf %26 : vector<128x128xf32> to vector<128x128xbf16>
    %c0_16 = arith.constant 0 : index
    %c0_17 = arith.constant 0 : index
    %28 = vector.load %arg17[%c0_16, %c0_17] : memref<64x128xf32, #tpu.memory_space<vmem>>, vector<64x128xf32>
    %cst_18 = arith.constant dense<0.000000e+00> : vector<64x128xf32>
    %29 = tpu.matmul %15, %27, %cst_18 {dimension_numbers = #tpu.dot_dimension_numbers<[1], [0], [0], [1], [0, 0, 1, 1], [], []>} : vector<64x128xbf16>, vector<128x128xbf16>, vector<64x128xf32> -> vector<64x128xf32>
    %30 = arith.addf %28, %29 : vector<64x128xf32>
    %c0_19 = arith.constant 0 : index
    %c0_20 = arith.constant 0 : index
    %31 = vector.load %arg17[%c0_19, %c0_20] : memref<64x128xf32, #tpu.memory_space<vmem>>, vector<64x128xf32>
    tpu.vector_store %arg17[%c0_19, %c0_20], %30 {strides = array<i32>} : memref<64x128xf32, #tpu.memory_space<vmem>>, vector<64x128xf32>,
    %c1_i32 = arith.constant 1 : i32
    %32 = arith.cmpi eq, %arg0, %c1_i32 : i32
    %33 = arith.extui %32 : i1 to i32
    %c0_i32_21 = arith.constant 0 : i32
    %34 = arith.cmpi ne, %33, %c0_i32_21 : i32
    scf.if %34 {
      %c0_22 = arith.constant 0 : index
      %c0_23 = arith.constant 0 : index
      %35 = vector.load %arg3[%c0_22, %c0_23] : memref<64x4xf32, #tpu.memory_space<vmem>>, vector<64x4xf32>
      %c0_24 = arith.constant 0 : index
      %c0_25 = arith.constant 0 : index
      %36 = vector.load %arg10[%c0_24, %c0_25] : memref<4x128xf32, #tpu.memory_space<vmem>>, vector<4x128xf32>
      %cst_26 = arith.constant dense<0.000000e+00> : vector<64x128xf32>
      %37 = tpu.matmul %35, %36, %cst_26 {dimension_numbers = #tpu.dot_dimension_numbers<[1], [0], [0], [1], [0, 0, 1, 1], [], []>} : vector<64x4xf32>, vector<4x128xf32>, vector<64x128xf32> -> vector<64x128xf32>
      %c0_27 = arith.constant 0 : index
      %c0_28 = arith.constant 0 : index
      %38 = vector.load %arg17[%c0_27, %c0_28] : memref<64x128xf32, #tpu.memory_space<vmem>>, vector<64x128xf32>
      %c0_29 = arith.constant 0 : index
      %c0_30 = arith.constant 0 : index
      %39 = vector.load %arg11[%c0_29, %c0_30] : memref<128x128xf32, #tpu.memory_space<vmem>>, vector<128x128xf32>
      %cst_31 = arith.constant dense<0.000000e+00> : vector<64x128xf32>
      %40 = tpu.matmul %38, %39, %cst_31 {dimension_numbers = #tpu.dot_dimension_numbers<[1], [0], [0], [1], [0, 0, 1, 1], [], []>} : vector<64x128xf32>, vector<128x128xf32>, vector<64x128xf32> -> vector<64x128xf32>
      %41 = arith.addf %37, %40 : vector<64x128xf32>
      %c0_32 = arith.constant 0 : index
      %c0_33 = arith.constant 0 : index
      %42 = vector.load %arg12[%c0_32, %c0_33] : memref<1x128xf32, #tpu.memory_space<vmem>>, vector<1x128xf32>
      %43 = vector.broadcast %42 : vector<1x128xf32> to vector<64x128xf32>
      %44 = arith.addf %41, %43 : vector<64x128xf32>
      %c0_34 = arith.constant 0 : index
      %c0_35 = arith.constant 0 : index
      %45 = vector.load %arg4[%c0_34, %c0_35] : memref<2x64xbf16, #tpu.memory_space<vmem>>, vector<2x64xbf16>
      %46 = arith.extf %45 : vector<2x64xbf16> to vector<2x64xf32>
      %cst_36 = arith.constant dense<0.000000e+00> : vector<2x128xf32>
      %47 = tpu.matmul %46, %44, %cst_36 {dimension_numbers = #tpu.dot_dimension_numbers<[1], [0], [0], [1], [0, 0, 1, 1], [], []>} : vector<2x64xf32>, vector<64x128xf32>, vector<2x128xf32> -> vector<2x128xf32>
      %c0_37 = arith.constant 0 : index
      %c0_38 = arith.constant 0 : index
      %48 = vector.load %arg5[%c0_37, %c0_38] : memref<2x1xf32, #tpu.memory_space<vmem>>, vector<2x1xf32>
      %49 = vector.broadcast %48 : vector<2x1xf32> to vector<2x128xf32>
      %50 = arith.mulf %47, %49 : vector<2x128xf32>
      %cst_39 = arith.constant dense<0.000000e+00> : vector<64x128xf32>
      %51 = tpu.matmul %46, %50, %cst_39 {dimension_numbers = #tpu.dot_dimension_numbers<[0], [0], [1], [1], [0, 1, 1, 1], [], []>} : vector<2x64xf32>, vector<2x128xf32>, vector<64x128xf32> -> vector<64x128xf32>
      %52 = arith.subf %44, %51 : vector<64x128xf32>
      %c0_40 = arith.constant 0 : index
      %c0_41 = arith.constant 0 : index
      %53 = vector.load %arg13[%c0_40, %c0_41] : memref<64x128xf32, #tpu.memory_space<vmem>>, vector<64x128xf32>
      tpu.vector_store %arg13[%c0_40, %c0_41], %52 {strides = array<i32>} : memref<64x128xf32, #tpu.memory_space<vmem>>, vector<64x128xf32>,
    } else {
    }
    return
  }
  func.func @transform_0(%arg0: i32) -> (i32, i32) {
    %c0_i32 = arith.constant 0 : i32
    %c0_i32_0 = arith.constant 0 : i32
    return %c0_i32, %arg0 : i32, i32
  }
  func.func @transform_1(%arg0: i32) -> (i32, i32) {
    %c0_i32 = arith.constant 0 : i32
    %c0_i32_0 = arith.constant 0 : i32
    return %c0_i32, %arg0 : i32, i32
  }
  func.func @transform_2(%arg0: i32) -> (i32, i32) {
    %c0_i32 = arith.constant 0 : i32
    %c0_i32_0 = arith.constant 0 : i32
    %c0_i32_1 = arith.constant 0 : i32
    return %c0_i32, %c0_i32_0 : i32, i32
  }
  func.func @transform_3(%arg0: i32) -> (i32, i32) {
    %c0_i32 = arith.constant 0 : i32
    %c0_i32_0 = arith.constant 0 : i32
    %c0_i32_1 = arith.constant 0 : i32
    return %c0_i32, %c0_i32_0 : i32, i32
  }
  func.func @transform_4(%arg0: i32) -> (i32, i32) {
    %c0_i32 = arith.constant 0 : i32
    %c0_i32_0 = arith.constant 0 : i32
    %c0_i32_1 = arith.constant 0 : i32
    return %c0_i32, %c0_i32_0 : i32, i32
  }
  func.func @transform_5(%arg0: i32) -> (i32, i32) {
    %c0_i32 = arith.constant 0 : i32
    %c0_i32_0 = arith.constant 0 : i32
    %c0_i32_1 = arith.constant 0 : i32
    return %c0_i32, %c0_i32_0 : i32, i32
  }
  func.func @transform_6(%arg0: i32) -> (i32, i32) {
    %c0_i32 = arith.constant 0 : i32
    %c0_i32_0 = arith.constant 0 : i32
    %c0_i32_1 = arith.constant 0 : i32
    return %c0_i32, %c0_i32_0 : i32, i32
  }
  func.func @transform_7(%arg0: i32) -> (i32, i32) {
    %c0_i32 = arith.constant 0 : i32
    %c0_i32_0 = arith.constant 0 : i32
    %c0_i32_1 = arith.constant 0 : i32
    return %c0_i32, %c0_i32_0 : i32, i32
  }
  func.func @transform_8(%arg0: i32) -> (i32, i32) {
    %c0_i32 = arith.constant 0 : i32
    %c0_i32_0 = arith.constant 0 : i32
    %c0_i32_1 = arith.constant 0 : i32
    return %c0_i32, %c0_i32_0 : i32, i32
  }
  func.func @transform_9(%arg0: i32) -> (i32, i32) {
    %c0_i32 = arith.constant 0 : i32
    %c0_i32_0 = arith.constant 0 : i32
    %c0_i32_1 = arith.constant 0 : i32
    return %c0_i32, %c0_i32_0 : i32, i32
  }
  func.func @transform_10(%arg0: i32) -> (i32, i32) {
    %c0_i32 = arith.constant 0 : i32
    %c0_i32_0 = arith.constant 0 : i32
    %c0_i32_1 = arith.constant 0 : i32
    return %c0_i32, %c0_i32_0 : i32, i32
  }
  func.func @transform_11(%arg0: i32) -> (i32, i32) {
    %c0_i32 = arith.constant 0 : i32
    %c0_i32_0 = arith.constant 0 : i32
    %c0_i32_1 = arith.constant 0 : i32
    return %c0_i32, %c0_i32_0 : i32, i32
  }
  func.func @transform_12(%arg0: i32) -> (i32, i32) {
    %c0_i32 = arith.constant 0 : i32
    %c0_i32_0 = arith.constant 0 : i32
    %c0_i32_1 = arith.constant 0 : i32
    return %c0_i32, %c0_i32_0 : i32, i32
  }
}

</mosaic_0001>

<bundles_post_ra>
// kernel: generator_data_adaptor_forward.1
= control target key start
LH: loop header
LB: loop body
LE: loop exit
PB: predicated region body
PF: predicated region fallthrough
CT: control target
= control target key end

     0   :  { %s2545_s21 = smov 0   ;;  %s2866_s0 = inlined_call_operand.vmem [shape: s32[2,256], index: 0, kind: input, shape index: {}]   ;;  %s2867_s1 = inlined_call_operand.vmem [shape: bf16[4,256], index: 1, kind: input, shape index: {}]   ;;  %s2868_s2 = inlined_call_operand.vmem [shape: f32[64,4], index: 2, kind: input, shape index: {}]   ;;  %s2869_s3 = inlined_call_operand.vmem [shape: bf16[2,64], index: 3, kind: input, shape index: {}]   ;;  %s2870_s4 = inlined_call_operand.vmem [shape: f32[2,1], index: 4, kind: input, shape index: {}]   ;;  %s2871_s5 = inlined_call_operand.vmem [shape: f32[4,128], index: 5, kind: input, shape index: {}]   ;;  %s2872_s6 = inlined_call_operand.vmem [shape: f32[4,128], index: 6, kind: input, shape index: {}]   ;;  %s2873_s7 = inlined_call_operand.vmem [shape: bf16[4,128], index: 7, kind: input, shape index: {}]   ;;  %s2874_s8 = inlined_call_operand.vmem [shape: f32[1,128], index: 8, kind: input, shape index: {}]   ;;  %s2875_s9 = inlined_call_operand.vmem [shape: f32[4,128], index: 9, kind: input, shape index: {}]   ;;  %s2876_s10 = inlined_call_operand.vmem [shape: f32[128,128], index: 10, kind: input, shape index: {}]   ;;  %s2877_s11 = inlined_call_operand.vmem [shape: f32[1,128], index: 11, kind: input, shape index: {}]   ;;  %s2878_s12 = inlined_call_operand.vmem [shape: f32[64,128], index: 12, kind: output, shape index: {}]  }
   0x1 LB: > { %s2551_s22 = sadd.s32 4294967295, %s2471_s21   ;;  %p1944_p0 = scmp.ge.s32.totalorder %s2471_s21, 1  ;;  %s2471_s21 = sphi %s2545_s21, %s22_s21  }
   0x2   : > { %p365_p1 = scmp.lt.s32.totalorder %s2471_s21, 3 }
   0x4   : > { %p366_p2 = pnand %p1944_p0, %p365_p1 }
   0x5   : > { %p405_p3 = scmp.lt.s32.totalorder (!%p366_p2), %s2551_s22, 1  ;;  %p1947_p4 = scmp.ne.s32.totalorder (!%p366_p2), %s2551_s22, 0 }
   0x6   : > { %369 = sbr.rel (%p366_p2) target bundleno = 1554 (0x612), region = 68 }
   0xd   : > { %s406_s23 = scalar_select %p405_p3, %s2551_s22, 1 }
   0xe   : > { %417 = sbr.rel (%p1947_p4) target bundleno = 247 (0xf7), region = 72  ;;  %v426_v0 = vld [vmem:[%s2871_s5] sm:$0xf] (!%p1947_p4)  ;;  %vm459_vm0 = vcmask (!%p1947_p4), 1043456   ;;  %vm434_vm1 = vcmask (!%p1947_p4), 31744   ;;  %v419_v2 = vld [vmem:[%s2868_s2 + $0x8] sm:$0xff] (!%p1947_p4)  ;;  %v701_v10 = vlaneseq (!%p1947_p4) }
   0xf   : > { %s1945_s24 = sshll.u32 %s406_s23, 1  ;;  %v418_v1 = vld [vmem:[%s2868_s2] sm:$0xff] (!%p1947_p4)  ;;  %2154 = vmatprep.subr.msk.mxu0 (!%p1947_p4), %vm459_vm0, %v426_v0  ;;  %v420_v4 = vld [vmem:[%s2868_s2 + $0x10] sm:$0xff] (!%p1947_p4)  ;;  %v421_v5 = vld [vmem:[%s2868_s2 + $0x18] sm:$0xff] (!%p1947_p4)  ;;  %v2473_v19 = vmov (!%p1947_p4), 0.0  }
  0x10   : > { %s2560_s27 = scalar_lea.vmem %s2866_s0, %s1945_s24  ;;  %s2565_s30 = scalar_lea.vmem %s2867_s1, %s1945_s24  ;;  %2156 = vmatprep.mubr.msk.f32.mxu0 (!%p1947_p4), %vm434_vm1, %v418_v1  ;;  %v576_v3 = vld [vmem:[%s2872_s6] sm:$0xf] (!%p1947_p4)  ;;  %2155 = vmatpush3.msk.msra.mxu0 (!%p1947_p4), %vm459_vm0, %v426_v0  ;;  %v423_v7 = vld [vmem:[%s2868_s2 + $0x28] sm:$0xff] (!%p1947_p4)  ;;  %v424_v8 = vld [vmem:[%s2868_s2 + $0x30] sm:$0xff] (!%p1947_p4)  ;;  %v702_v11 = vshrl.u32 (!%p1947_p4), %v701_v10, 7  ;;  %693 = vst [vmem:[#allocation5] sm:$0xff] (!%p1947_p4), %v2473_v19 }
  0x11   : > { %2168 = vmatprep.subr.msk.mxu1 (!%p1947_p4), %vm459_vm0, %v576_v3  ;;  %2157 = vmatmul.mubr.msk.f32.vlgmr.msra.gmra.mrb[0].mxu0 (!%p1947_p4), %vm434_vm1, %v419_v2  ;;  %v422_v6 = vld [vmem:[%s2868_s2 + $0x20] sm:$0xff] (!%p1947_p4)  ;;  %v425_v9 = vld [vmem:[%s2868_s2 + $0x38] sm:$0xff] (!%p1947_p4)  ;;  %694 = vst [vmem:[#allocation5 + $0x8] sm:$0xff] (!%p1947_p4), %v2473_v19  ;;  %695 = vst [vmem:[#allocation5 + $0x10] sm:$0xff] (!%p1947_p4), %v2473_v19 }
  0x12   : > { %2169 = vmatpush3.msk.msra.mxu1 (!%p1947_p4), %vm459_vm0, %v576_v3  ;;  %2170 = vmatprep.mubr.msk.f32.mxu1 (!%p1947_p4), %vm434_vm1, %v418_v1  ;;  %v703_v12 = vadd.s32 (!%p1947_p4), 8, %v702_v11  ;;  %v704_v13 = vadd.s32 (!%p1947_p4), 16, %v702_v11  ;;  %v705_v14 = vadd.s32 (!%p1947_p4), 24, %v702_v11  ;;  %v706_v15 = vadd.s32 (!%p1947_p4), 32, %v702_v11  ;;  %710 = vst [vmem:[#allocation2] sm:$0xff] (!%p1947_p4), %v702_v11  ;;  %696 = vst [vmem:[#allocation5 + $0x18] sm:$0xff] (!%p1947_p4), %v2473_v19 }
  0x13   : > { %2159 = vmatprep.mubr.msk.f32.mxu0 (!%p1947_p4), %vm434_vm1, %v420_v4  ;;  %2171 = vmatmul.mubr.msk.f32.vlgmr.msra.gmra.mrb[0].mxu1 (!%p1947_p4), %vm434_vm1, %v419_v2  ;;  %v707_v16 = vadd.s32 (!%p1947_p4), 40, %v702_v11  ;;  %v708_v17 = vadd.s32 (!%p1947_p4), 48, %v702_v11  ;;  %v709_v18 = vadd.s32 (!%p1947_p4), 56, %v702_v11  ;;  %697 = vst [vmem:[#allocation5 + $0x20] sm:$0xff] (!%p1947_p4), %v2473_v19  ;;  %698 = vst [vmem:[#allocation5 + $0x28] sm:$0xff] (!%p1947_p4), %v2473_v19 }
  0x14   : > { %2173 = vmatprep.mubr.msk.f32.mxu1 (!%p1947_p4), %vm434_vm1, %v420_v4  ;;  %699 = vst [vmem:[#allocation5 + $0x30] sm:$0xff] (!%p1947_p4), %v2473_v19  ;;  %700 = vst [vmem:[#allocation5 + $0x38] sm:$0xff] (!%p1947_p4), %v2473_v19  ;;  %v1948_v20 = vld [vmem:[%s2874_s8] ss:$0 sm:$0xff] (!%p1947_p4) }
  0x15   : > { %2160 = vmatmul.mubr.msk.f32.gmra.mrb[2].mxu0 %vm434_vm1, %v421_v5  ;;  %711 = vst [vmem:[#allocation2 + $0x8] sm:$0xff] %v703_v12  ;;  %712 = vst [vmem:[#allocation2 + $0x10] sm:$0xff] %v704_v13 }
  0x16   : > { %2162 = vmatprep.mubr.msk.f32.mxu0 %vm434_vm1, %v422_v6  ;;  %713 = vst [vmem:[#allocation2 + $0x18] sm:$0xff] %v705_v14  ;;  %714 = vst [vmem:[#allocation2 + $0x20] sm:$0xff] %v706_v15 }
  0x17   : > { %2174 = vmatmul.mubr.msk.f32.gmra.mrb[2].mxu1 %vm434_vm1, %v421_v5  ;;  %715 = vst [vmem:[#allocation2 + $0x28] sm:$0xff] %v707_v16  ;;  %716 = vst [vmem:[#allocation2 + $0x30] sm:$0xff] %v708_v17 }
  0x18   : > { %2176 = vmatprep.mubr.msk.f32.mxu1 %vm434_vm1, %v422_v6  ;;  %717 = vst [vmem:[#allocation2 + $0x38] sm:$0xff] %v709_v18 }
  0x19   : > { %2163 = vmatmul.mubr.msk.f32.gmra.mrb[4].mxu0 %vm434_vm1, %v423_v7 }
  0x1a   : > { %2165 = vmatprep.mubr.msk.f32.mxu0 %vm434_vm1, %v424_v8 }
  0x1b   : > { %2177 = vmatmul.mubr.msk.f32.gmra.mrb[4].mxu1 %vm434_vm1, %v423_v7 }
  0x1c   : > { %2179 = vmatprep.mubr.msk.f32.mxu1 %vm434_vm1, %v424_v8 }
  0x1d   : > { %2166 = vmatmul.mubr.msk.f32.gmra.mrb[6].mxu0 %vm434_vm1, %v425_v9 }
  0x1f   : > { %2180 = vmatmul.mubr.msk.f32.gmra.mrb[6].mxu1 %vm434_vm1, %v425_v9 }
  0xe4   : > { %v2158_v21 = vpop.f32.mrb[0].mxu0 }
  0xe5   : > { %v535_v22 = vadd.f32 %v2158_v21, %v1948_v20  ;;  %v529_v23 = vpop.f32.mrb[1].mxu0 }
  0xe6   : > { %v530_v24 = vadd.f32 %v1948_v20, %v529_v23  ;;  %v2172_v25 = vpop.f32.mrb[0].mxu1 }
  0xe7   : > { %v646_v26 = vpop.f32.mrb[1].mxu1 }
  0xe8   : > { %v568_v27 = vpack.c.bf16 %v535_v22, %v530_v24  ;;  %v685_v28 = vpack.c.bf16 %v2172_v25, %v646_v26  ;;  %v2161_v29 = vpop.f32.mrb[2].mxu0 }
  0xe9   : > { %v545_v30 = vadd.f32 %v2161_v29, %v1948_v20  ;;  %v539_v31 = vpop.f32.mrb[3].mxu0 }
  0xea   : > { %572 = vst [vmem:[#allocation3] sm:$0xff] %v568_v27  ;;  %689 = vst [vmem:[#allocation4] sm:$0xff] %v685_v28  ;;  %v540_v32 = vadd.f32 %v1948_v20, %v539_v31  ;;  %v2175_v33 = vpop.f32.mrb[2].mxu1 }
  0xeb   : > { %v656_v34 = vpop.f32.mrb[3].mxu1 }
  0xec   : > { %v569_v35 = vpack.c.bf16 %v545_v30, %v540_v32  ;;  %v686_v36 = vpack.c.bf16 %v2175_v33, %v656_v34  ;;  %v2164_v37 = vpop.f32.mrb[4].mxu0 }
  0xed   : > { %v555_v38 = vadd.f32 %v2164_v37, %v1948_v20  ;;  %v549_v39 = vpop.f32.mrb[5].mxu0 }
  0xee   : > { %573 = vst [vmem:[#allocation3 + $0x8] sm:$0xff] %v569_v35  ;;  %690 = vst [vmem:[#allocation4 + $0x8] sm:$0xff] %v686_v36  ;;  %v550_v40 = vadd.f32 %v1948_v20, %v549_v39  ;;  %v2178_v41 = vpop.f32.mrb[4].mxu1 }
  0xef   : > { %v666_v42 = vpop.f32.mrb[5].mxu1 }
  0xf0   : > { %v570_v43 = vpack.c.bf16 %v555_v38, %v550_v40  ;;  %v687_v44 = vpack.c.bf16 %v2178_v41, %v666_v42  ;;  %v2167_v45 = vpop.f32.mrb[6].mxu0 }
  0xf1   : > { %v565_v46 = vadd.f32 %v2167_v45, %v1948_v20  ;;  %v559_v47 = vpop.f32.mrb[7].mxu0 }
  0xf2   : > { %574 = vst [vmem:[#allocation3 + $0x10] sm:$0xff] %v570_v43  ;;  %691 = vst [vmem:[#allocation4 + $0x10] sm:$0xff] %v687_v44  ;;  %v560_v48 = vadd.f32 %v1948_v20, %v559_v47  ;;  %v2181_v49 = vpop.f32.mrb[6].mxu1 }
  0xf3   : > { %v676_v50 = vpop.f32.mrb[7].mxu1 }
  0xf4   : > { %v571_v51 = vpack.c.bf16 %v565_v46, %v560_v48  ;;  %v688_v52 = vpack.c.bf16 %v2181_v49, %v676_v50 }
  0xf6   : > { %575 = vst [vmem:[#allocation3 + $0x18] sm:$0xff] %v571_v51  ;;  %692 = vst [vmem:[#allocation4 + $0x18] sm:$0xff] %v688_v52 }
  0xf7 PF: > { %v1967_v55 = vld [vmem:[%s2560_s27] ss:$0 sm:$0xff]  ;;  %v721_v57 = vld [vmem:[#allocation2 + $0x18] sm:$0xff]  ;;  %v2474_v59 = vmov 0.0   ;;  %v2622_v62 = vld [vmem:[#allocation2 + $0x28] sm:$0xff]  ;;  %vm1118_vm9 = vcmask 1041408  }
  0xf8   : > { %v2618_v58 = vld [vmem:[#allocation2 + $0x20] sm:$0xff]  ;;  %vm734_vm5 = vcmp.eq.s32.totalorder %v1967_v55, %v721_v57  ;;  %v2627_v2 = vld [vmem:[#allocation2 + $0x30] sm:$0xff]  ;;  %vm736_vm7 = vcmp.eq.s32.totalorder %v1967_v55, %v2622_v62  ;;  %v2633_v4 = vld [vmem:[#allocation2 + $0x38] sm:$0xff]  ;;  %p2017_p5 = scmp.ne.s32.totalorder %s2551_s22, 1 }
  0xf9   : > { %v1971_v1 = vsel %vm734_vm5, 1.0, %v2474_v59  ;;  %vm735_vm6 = vcmp.eq.s32.totalorder %v1967_v55, %v2618_v58  ;;  %v2630_v3 = vld [vmem:[%s2560_s27 + $0x1] ss:$0 sm:$0xff]  ;;  %v793_v6 = vld [vmem:[#allocation3 + $0x8] sm:$0xff]  ;;  %v1973_v10 = vsel %vm736_vm7, 1.0, %v2474_v59  ;;  %vm737_vm10 = vcmp.eq.s32.totalorder %v1967_v55, %v2627_v2  ;;  %v794_v20 = vld [vmem:[#allocation3 + $0x10] sm:$0xff] }
  0xfa   : > { %v792_v5 = vld [vmem:[#allocation3] sm:$0xff]  ;;  %v1972_v8 = vsel %vm735_vm6, 1.0, %v2474_v59  ;;  %v797_v12 = vld [vmem:[#allocation4 + $0x8] sm:$0xff]  ;;  %vm738_vm12 = vcmp.eq.s32.totalorder %v1967_v55, %v2633_v4  ;;  %vm767_vm15 = vcmp.eq.s32.totalorder %v2630_v3, %v721_v57  ;;  %vm768_vm1 = vcmp.eq.s32.totalorder %v2630_v3, %v2618_v58  ;;  %v798_v22 = vld [vmem:[#allocation4 + $0x10] sm:$0xff] }
  0xfb   : > { %v718_v53 = vld [vmem:[#allocation2] sm:$0xff]  ;;  %2206 = vmatprep.subr.bf16.mxu0 %v792_v5  ;;  %v1980_v18 = vsel %vm767_vm15, 1.0, %v2474_v59  ;;  %v757_v21 = vpack.c.bf16 %v1973_v10, %v1972_v8  ;;  %v1974_v23 = vsel %vm737_vm10, 1.0, %v2474_v59  ;;  %v1975_v24 = vsel %vm738_vm12, 1.0, %v2474_v59  ;;  %v1261_v58 = vld [vmem:[#allocation5 + $0x10] sm:$0xff] }
  0xfc   : > { %vm731_vm2 = vcmp.eq.s32.totalorder %v1967_v55, %v718_v53  ;;  %vm764_vm8 = vcmp.eq.s32.totalorder %v2630_v3, %v718_v53  ;;  %v796_v9 = vld [vmem:[#allocation4] sm:$0xff]  ;;  %2207 = vmatpush3.bf16.msra.mxu0 %v792_v5  ;;  %v1981_v27 = vsel %vm768_vm1, 1.0, %v2474_v59  ;;  %v758_v30 = vpack.c.bf16 %v1975_v24, %v1974_v23 }
  0xfd   : > { %v1968_v60 = vsel %vm731_vm2, 1.0, %v2474_v59  ;;  %v1977_v11 = vsel %vm764_vm8, 1.0, %v2474_v59  ;;  %2182 = vmatprep.subr.bf16.mxu1 %v796_v9  ;;  %2208 = vmatprep.subr.bf16.mxu0 %v793_v6  ;;  %v1076_v15 = vld [vmem:[%s2873_s7] sm:$0x3]  ;;  %vm769_vm2 = vcmp.eq.s32.totalorder %v2630_v3, %v2622_v62  ;;  %v795_v29 = vld [vmem:[#allocation3 + $0x18] sm:$0xff]  ;;  %vm816_vm5 = vcmask 523264  }
  0xfe   : > { %v719_v54 = vld [vmem:[#allocation2 + $0x8] sm:$0xff]  ;;  %v720_v56 = vld [vmem:[#allocation2 + $0x10] sm:$0xff]  ;;  %2183 = vmatpush3.bf16.msra.mxu1 %v796_v9  ;;  %v1120_v26 = vsel %vm1118_vm9, %v1076_v15, 0  ;;  %v1982_v28 = vsel %vm769_vm2, 1.0, %v2474_v59  ;;  %v799_v31 = vld [vmem:[#allocation4 + $0x18] sm:$0xff]  ;;  %vm1093_vm6 = vcmask 31744  }
  0xff   : > { %vm732_vm3 = vcmp.eq.s32.totalorder %v1967_v55, %v719_v54  ;;  %vm733_vm4 = vcmp.eq.s32.totalorder %v1967_v55, %v720_v56  ;;  %vm765_vm11 = vcmp.eq.s32.totalorder %v2630_v3, %v719_v54  ;;  %vm766_vm14 = vcmp.eq.s32.totalorder %v2630_v3, %v720_v56  ;;  %2184 = vmatprep.subr.bf16.mxu1 %v797_v12  ;;  %v1075_v36 = vld [vmem:[%s2565_s30] sm:$0x3]  ;;  %vm2013_vm7 = vmpackc.low %vm769_vm2, %vm768_vm1  ;;  %v1262_v62 = vld [vmem:[#allocation5 + $0x18] sm:$0xff] }
 0x100   : > { %v1969_v61 = vsel %vm732_vm3, 1.0, %v2474_v59  ;;  %v1970_v0 = vsel %vm733_vm4, 1.0, %v2474_v59  ;;  %v1978_v13 = vsel %vm765_vm11, 1.0, %v2474_v59  ;;  %vm2643_vm13 = vmpackc.low %vm765_vm11, %vm764_vm8  ;;  %v1979_v17 = vsel %vm766_vm14, 1.0, %v2474_v59  ;;  %2209 = vmatpush3.bf16.msra.mxu0 %v793_v6 }
 0x101   : > { %v755_v63 = vpack.c.bf16 %v1969_v61, %v1968_v60  ;;  %v756_v7 = vpack.c.bf16 %v1971_v1, %v1970_v0  ;;  %v788_v16 = vpack.c.bf16 %v1978_v13, %v1977_v11  ;;  %vm2654_vm0 = vmpackc.low %vm767_vm15, %vm766_vm14  ;;  %v789_v25 = vpack.c.bf16 %v1980_v18, %v1979_v17  ;;  %2210 = vmatprep.subr.bf16.mxu0 %v794_v20 }
 0x102   : > { %2185 = vmatpush3.bf16.msra.mxu1 %v797_v12  ;;  %vm770_vm3 = vcmp.eq.s32.totalorder %v2630_v3, %v2627_v2  ;;  %vm771_vm4 = vcmp.eq.s32.totalorder %v2630_v3, %v2633_v4  ;;  %v790_v32 = vpack.c.bf16 %v1982_v28, %v1981_v27  ;;  %v1265_v3 = vld [vmem:[#allocation5 + $0x30] sm:$0xff]  ;;  %v1263_v4 = vld [vmem:[#allocation5 + $0x20] sm:$0xff]  ;;  %vm1514_vm10 = vcmask (!%p2017_p5), 1043456  }
 0x103   : > { %938 = vxpose.xlu0.c.b16.start [1/4] (short) %v755_v63, 128  ;;  %800 = vxpose.xlu1.c.b16.start [1/4] (short) %v788_v16, 128  ;;  %v1983_v33 = vsel %vm770_vm3, 1.0, %v2474_v59  ;;  %v1984_v34 = vsel %vm771_vm4, 1.0, %v2474_v59  ;;  %v2475_v63 = vmov 1.0|1.0   ;;  %vm2015_vm8 = vmpackc.low %vm771_vm4, %vm770_vm3  ;;  %vm2477_vm11 = vmmov (!%p2017_p5), 0  }
 0x104   : > { %2186 = vmatprep.subr.bf16.mxu1 %v798_v22  ;;  %2211 = vmatpush3.bf16.msra.mxu0 %v794_v20  ;;  %v791_v35 = vpack.c.bf16 %v1984_v34, %v1983_v33  ;;  %vm1752_vm12 = vcmask (!%p2017_p5), 15360  }
 0x105   : > { %2212 = vmatprep.subr.bf16.mxu0 %v795_v29 }
 0x106   : > { %2187 = vmatpush3.bf16.msra.mxu1 %v798_v22 }
 0x107   : > { %939 = vxpose.xlu0.c.b16.cont [2/4] (short) %v756_v7, 128  ;;  %801 = vxpose.xlu1.c.b16.cont [2/4] (short) %v789_v25, 128 }
 0x108   : > { %2188 = vmatprep.subr.bf16.mxu1 %v799_v31  ;;  %2213 = vmatpush3.bf16.msra.mxu0 %v795_v29 }
 0x109   : > { %2447 = vmatprep.subr.msk.bf16.mxu0 %vm1118_vm9, %v1076_v15 }
 0x10a   : > { %2189 = vmatpush3.bf16.msra.mxu1 %v799_v31 }
 0x10b   : > { %940 = vxpose.xlu0.c.b16.cont [3/4] (short) %v757_v21, 128  ;;  %802 = vxpose.xlu1.c.b16.cont [3/4] (short) %v790_v32, 128 }
 0x10f   : > { %941 = vxpose.xlu0.c.b16.end [4/4] (short) %v758_v30, 128  ;;  %803 = vxpose.xlu1.c.b16.end [4/4] (short) %v791_v35, 128 }
 0x120   : > { %1077 = vxpose.xlu0.c.b16.start.end [1/1] (short) %v1075_v36, 128 }
 0x169   : > { %v946_v37 = vpop.trf.xlu0  ;;  %v808_v39 = vpop.trf.xlu1 }
 0x16a   : > { %2214 = vmatprep.mubr.msk.bf16.mxu0 %vm816_vm5, %v946_v37  ;;  %2190 = vmatprep.mubr.msk.bf16.mxu1 %vm816_vm5, %v808_v39 }
 0x16d   : > { %v947_v38 = vpop.trf.xlu0  ;;  %v809_v41 = vpop.trf.xlu1 }
 0x16e   : > { %2215 = vmatmul.mubr.msk.bf16.vlgmr.msra.gmra.mrb[0].mxu0 %vm816_vm5, %v947_v38  ;;  %2191 = vmatmul.mubr.msk.bf16.vlgmr.msra.gmra.mrb[0].mxu1 %vm816_vm5, %v809_v41 }
 0x16f   : > { %2231 = vmatpush3.bf16.msra.mxu0 %v1120_v26 }
 0x171   : > { %v948_v40 = vpop.trf.xlu0  ;;  %v810_v43 = vpop.trf.xlu1 }
 0x172   : > { %2218 = vmatprep.mubr.msk.bf16.mxu0 %vm816_vm5, %v948_v40  ;;  %2194 = vmatprep.mubr.msk.bf16.mxu1 %vm816_vm5, %v810_v43 }
 0x175   : > { %v949_v42 = vpop.trf.xlu0  ;;  %v811_v45 = vpop.trf.xlu1 }
 0x176   : > { %2219 = vmatmul.mubr.msk.bf16.gmra.mrb[4].mxu0 %vm816_vm5, %v949_v42  ;;  %2195 = vmatmul.mubr.msk.bf16.gmra.mrb[4].mxu1 %vm816_vm5, %v811_v45 }
 0x179   : > { %v950_v44 = vpop.trf.xlu0  ;;  %v812_v47 = vpop.trf.xlu1 }
 0x17a   : > { %2222 = vmatprep.mubr.msk.bf16.mxu0 %vm816_vm5, %v950_v44  ;;  %2198 = vmatprep.mubr.msk.bf16.mxu1 %vm816_vm5, %v812_v47 }
 0x17d   : > { %v951_v46 = vpop.trf.xlu0  ;;  %v813_v49 = vpop.trf.xlu1 }
 0x17e   : > { %2223 = vmatmul.mubr.msk.bf16.gmra.mrb[8].mxu0 %vm816_vm5, %v951_v46  ;;  %2199 = vmatmul.mubr.msk.bf16.gmra.mrb[8].mxu1 %vm816_vm5, %v813_v49 }
 0x181   : > { %v952_v48 = vpop.trf.xlu0  ;;  %v814_v51 = vpop.trf.xlu1 }
 0x182   : > { %2226 = vmatprep.mubr.msk.bf16.mxu0 %vm816_vm5, %v952_v48  ;;  %2202 = vmatprep.mubr.msk.bf16.mxu1 %vm816_vm5, %v814_v51 }
 0x185   : > { %v953_v50 = vpop.trf.xlu0  ;;  %v815_v53 = vpop.trf.xlu1 }
 0x186   : > { %2227 = vmatmul.mubr.msk.bf16.gmra.mrb[12].mxu0 %vm816_vm5, %v953_v50  ;;  %2203 = vmatmul.mubr.msk.bf16.gmra.mrb[12].mxu1 %vm816_vm5, %v815_v53 }
 0x187   : > { %2264 = vmatprep.mubr.msk.bf16.mxu1 %vm2643_vm13, %v2475_v63 }
 0x189   : > { %v1085_v52 = vpop.trf.xlu0 }
 0x18a   : > { %2232 = vmatprep.mubr.msk.bf16.mxu0 %vm1093_vm6, %v1085_v52 }
 0x18d   : > { %v1086_v54 = vpop.trf.xlu0 }
 0x18e   : > { %2233 = vmatmul.mubr.msk.bf16.vlgmr.msra.gmra.mrb[0].mxu0 %vm1093_vm6, %v1086_v54 }
 0x191   : > { %v1087_v55 = vpop.trf.xlu0 }
 0x192   : > { %2236 = vmatprep.mubr.msk.bf16.mxu0 %vm1093_vm6, %v1087_v55 }
 0x195   : > { %v1088_v56 = vpop.trf.xlu0 }
 0x196   : > { %2237 = vmatmul.mubr.msk.bf16.gmra.mrb[4].mxu0 %vm1093_vm6, %v1088_v56 }
 0x199   : > { %v1089_v57 = vpop.trf.xlu0 }
 0x19a   : > { %2240 = vmatprep.mubr.msk.bf16.mxu0 %vm1093_vm6, %v1089_v57 }
 0x19d   : > { %v1090_v59 = vpop.trf.xlu0 }
 0x19e   : > { %2241 = vmatmul.mubr.msk.bf16.gmra.mrb[8].mxu0 %vm1093_vm6, %v1090_v59 }
 0x1a1   : > { %v1091_v60 = vpop.trf.xlu0 }
 0x1a2   : > { %2244 = vmatprep.mubr.msk.bf16.mxu0 %vm1093_vm6, %v1091_v60 }
 0x1a5   : > { %v1092_v61 = vpop.trf.xlu0 }
 0x1a6   : > { %2245 = vmatmul.mubr.msk.bf16.gmra.mrb[12].mxu0 %vm1093_vm6, %v1092_v61 }
 0x241   : > { %v2192_v0 = vpop.f32.mrb[0].mxu1 }
 0x242   : > { %v875_v1 = vpop.f32.mrb[1].mxu1 }
 0x243   : > { %v2193_v5 = vpop.f32.mrb[2].mxu1 }
 0x244   : > { %v878_v6 = vpop.f32.mrb[3].mxu1 }
 0x249   : > { %v2196_v7 = vpop.f32.mrb[4].mxu1 }
 0x24a   : > { %v891_v8 = vpop.f32.mrb[5].mxu1 }
 0x24b   : > { %v2197_v9 = vpop.f32.mrb[6].mxu1 }
 0x24c   : > { %v894_v10 = vpop.f32.mrb[7].mxu1 }
 0x251   : > { %v2200_v11 = vpop.f32.mrb[8].mxu1 }
 0x252   : > { %v907_v12 = vpop.f32.mrb[9].mxu1 }
 0x253   : > { %v2201_v13 = vpop.f32.mrb[10].mxu1 }
 0x254   : > { %v910_v15 = vpop.f32.mrb[11].mxu1 }
 0x259   : > { %v2204_v16 = vpop.f32.mrb[12].mxu1 }
 0x25a   : > { %v923_v17 = vpop.f32.mrb[13].mxu1 }
 0x25b   : > { %v2205_v18 = vpop.f32.mrb[14].mxu1 }
 0x25c   : > { %v926_v21 = vpop.f32.mrb[15].mxu1 }
 0x261   : > { %v2234_v20 = vpop.f32.mrb[0].mxu0 }
 0x262   : > { %v2407_v22 = vadd.f32 %v2234_v20, %v2192_v0  ;;  %v1156_v14 = vpop.f32.mrb[1].mxu0 }
 0x263   : > { %v2408_v23 = vadd.f32 %v1156_v14, %v875_v1  ;;  %v2235_v24 = vpop.f32.mrb[2].mxu0 }
 0x264   : > { %v2409_v25 = vadd.f32 %v2235_v24, %v2193_v5  ;;  %v1159_v26 = vpop.f32.mrb[3].mxu0  ;;  %v1237_v28 = vmax.f32 %v2407_v22, 0.0 }
 0x265   : > { %v2410_v27 = vadd.f32 %v1159_v26, %v878_v6  ;;  %v1235_v30 = vmax.f32 %v2408_v23, 0.0  ;;  %v1260_v23 = vld [vmem:[#allocation5 + $0x8] sm:$0xff] }
 0x266   : > { %v1238_v29 = vmax.f32 %v2409_v25, 0.0 }
 0x267   : > { %v1236_v31 = vmax.f32 %v2410_v27, 0.0 }
 0x268   : > { %v1252_v32 = vpack.c.bf16 %v1238_v29, %v1237_v28 }
 0x269   : > { %v1251_v33 = vpack.c.bf16 %v1236_v31, %v1235_v30  ;;  %v2238_v34 = vpop.f32.mrb[4].mxu0  ;;  %v1264_v30 = vld [vmem:[#allocation5 + $0x28] sm:$0xff] }
 0x26a   : > { %v2411_v35 = vadd.f32 %v2238_v34, %v2196_v7  ;;  %v1172_v36 = vpop.f32.mrb[5].mxu0 }
 0x26b   : > { %v2412_v37 = vadd.f32 %v1172_v36, %v891_v8  ;;  %v2239_v38 = vpop.f32.mrb[6].mxu0  ;;  %2248 = vmatprep.subr.bf16.mxu1 %v1251_v33  ;;  %v1369_v36 = vld [vmem:[%s2876_s10] sm:$0xff] (!%p2017_p5) }
 0x26c   : > { %v2413_v39 = vadd.f32 %v2239_v38, %v2197_v9  ;;  %v1175_v40 = vpop.f32.mrb[7].mxu0  ;;  %2249 = vmatpush3.bf16.msra.mxu1 %v1251_v33  ;;  %v1241_v42 = vmax.f32 %v2411_v35, 0.0  ;;  %v1371_v38 = vld [vmem:[%s2876_s10 + $0x10] sm:$0xff] (!%p2017_p5) }
 0x26d   : > { %v2414_v41 = vadd.f32 %v1175_v40, %v894_v10  ;;  %2250 = vmatprep.subr.bf16.mxu1 %v1252_v32  ;;  %v1239_v44 = vmax.f32 %v2412_v37, 0.0  ;;  %v1370_v37 = vld [vmem:[%s2876_s10 + $0x8] sm:$0xff] (!%p2017_p5)  ;;  %v1372_v40 = vld [vmem:[%s2876_s10 + $0x18] sm:$0xff] (!%p2017_p5) }
 0x26e   : > { %v1242_v43 = vmax.f32 %v2413_v39, 0.0  ;;  %v2363_v39 = vpack.c.bf16 (!%p2017_p5), %v1370_v37, %v1369_v36 }
 0x26f   : > { %v1240_v45 = vmax.f32 %v2414_v41, 0.0  ;;  %v2367_v41 = vpack.c.bf16 (!%p2017_p5), %v1372_v40, %v1371_v38 }
 0x270   : > { %v1254_v46 = vpack.c.bf16 %v1242_v43, %v1241_v42  ;;  %2251 = vmatpush3.bf16.msra.mxu1 %v1252_v32  ;;  %v1373_v42 = vld [vmem:[%s2876_s10 + $0x20] sm:$0xff] (!%p2017_p5)  ;;  %v1374_v43 = vld [vmem:[%s2876_s10 + $0x28] sm:$0xff] (!%p2017_p5)  ;;  %2364 = vmatprep.subr.bf16.mxu0 (!%p2017_p5), %v2363_v39 }
 0x271   : > { %v1253_v47 = vpack.c.bf16 %v1240_v45, %v1239_v44  ;;  %v2242_v48 = vpop.f32.mrb[8].mxu0  ;;  %2366 = vmatpush3.bf16.msra.mxu0 (!%p2017_p5), %v2363_v39  ;;  %v2371_v44 = vpack.c.bf16 (!%p2017_p5), %v1374_v43, %v1373_v42  ;;  %v1375_v45 = vld [vmem:[%s2876_s10 + $0x30] sm:$0xff] (!%p2017_p5) }
 0x272   : > { %v2415_v49 = vadd.f32 %v2242_v48, %v2200_v11  ;;  %v1188_v50 = vpop.f32.mrb[9].mxu0  ;;  %2368 = vmatprep.subr.bf16.mxu0 (!%p2017_p5), %v2367_v41  ;;  %v1376_v48 = vld [vmem:[%s2876_s10 + $0x38] sm:$0xff] (!%p2017_p5) }
 0x273   : > { %v2416_v51 = vadd.f32 %v1188_v50, %v907_v12  ;;  %v2243_v52 = vpop.f32.mrb[10].mxu0  ;;  %2252 = vmatprep.subr.bf16.mxu1 %v1253_v47  ;;  %v1353_v50 = vld [vmem:[%s2868_s2 + $0x8] sm:$0xff] (!%p2017_p5) }
 0x274   : > { %v2417_v53 = vadd.f32 %v2243_v52, %v2201_v13  ;;  %v1191_v54 = vpop.f32.mrb[11].mxu0  ;;  %2253 = vmatpush3.bf16.msra.mxu1 %v1253_v47  ;;  %v1245_v56 = vmax.f32 %v2415_v49, 0.0  ;;  %v1352_v47 = vld [vmem:[%s2868_s2] sm:$0xff] (!%p2017_p5)  ;;  %v2375_v52 = vpack.c.bf16 (!%p2017_p5), %v1376_v48, %v1375_v45 }
 0x275   : > { %v2418_v55 = vadd.f32 %v1191_v54, %v910_v15  ;;  %2254 = vmatprep.subr.bf16.mxu1 %v1254_v46  ;;  %v1243_v59 = vmax.f32 %v2416_v51, 0.0  ;;  %v1354_v51 = vld [vmem:[%s2868_s2 + $0x10] sm:$0xff] (!%p2017_p5)  ;;  %2370 = vmatpush3.bf16.msra.mxu0 (!%p2017_p5), %v2367_v41  ;;  %v1377_v54 = vld [vmem:[%s2876_s10 + $0x40] sm:$0xff] (!%p2017_p5) }
 0x276   : > { %v1246_v57 = vmax.f32 %v2417_v53, 0.0  ;;  %2372 = vmatprep.subr.bf16.mxu0 (!%p2017_p5), %v2371_v44  ;;  %v1355_v53 = vld [vmem:[%s2868_s2 + $0x18] sm:$0xff] (!%p2017_p5) }
 0x277   : > { %v1244_v60 = vmax.f32 %v2418_v55, 0.0  ;;  %v1378_v55 = vld [vmem:[%s2876_s10 + $0x48] sm:$0xff] (!%p2017_p5) }
 0x278   : > { %v1256_v61 = vpack.c.bf16 %v1246_v57, %v1245_v56  ;;  %2255 = vmatpush3.bf16.msra.mxu1 %v1254_v46  ;;  %v1360_v46 = vld [vmem:[%s2875_s9] sm:$0xf] (!%p2017_p5)  ;;  %v2379_v57 = vpack.c.bf16 (!%p2017_p5), %v1378_v55, %v1377_v54 }
 0x279   : > { %v1255_v0 = vpack.c.bf16 %v1244_v60, %v1243_v59  ;;  %v2246_v1 = vpop.f32.mrb[12].mxu0  ;;  %v1356_v56 = vld [vmem:[%s2868_s2 + $0x20] sm:$0xff] (!%p2017_p5)  ;;  %2374 = vmatpush3.bf16.msra.mxu0 (!%p2017_p5), %v2371_v44  ;;  %v1357_v59 = vld [vmem:[%s2868_s2 + $0x28] sm:$0xff] (!%p2017_p5)  ;;  %v1379_v60 = vld [vmem:[%s2876_s10 + $0x50] sm:$0xff] (!%p2017_p5) }
 0x27a   : > { %v2419_v5 = vadd.f32 %v2246_v1, %v2204_v16  ;;  %v1204_v6 = vpop.f32.mrb[13].mxu0  ;;  %v1259_v16 = vld [vmem:[#allocation5] sm:$0xff]  ;;  %2376 = vmatprep.subr.bf16.mxu0 (!%p2017_p5), %v2375_v52 }
 0x27b   : > { %v2420_v7 = vadd.f32 %v1204_v6, %v923_v17  ;;  %v2247_v8 = vpop.f32.mrb[14].mxu0  ;;  %2256 = vmatprep.subr.bf16.mxu1 %v1255_v0  ;;  %v1381_v6 = vld [vmem:[%s2876_s10 + $0x60] sm:$0xff] (!%p2017_p5) }
 0x27c   : > { %v2421_v9 = vadd.f32 %v2247_v8, %v2205_v18  ;;  %v1207_v10 = vpop.f32.mrb[15].mxu0  ;;  %2257 = vmatpush3.bf16.msra.mxu1 %v1255_v0  ;;  %v1249_v12 = vmax.f32 %v2419_v5, 0.0  ;;  %v1358_v0 = vld [vmem:[%s2868_s2 + $0x30] sm:$0xff] (!%p2017_p5)  ;;  %v1359_v5 = vld [vmem:[%s2868_s2 + $0x38] sm:$0xff] (!%p2017_p5) }
 0x27d   : > { %v2422_v11 = vadd.f32 %v1207_v10, %v926_v21  ;;  %2258 = vmatprep.subr.bf16.mxu1 %v1256_v61  ;;  %v1247_v15 = vmax.f32 %v2420_v7, 0.0  ;;  %2378 = vmatpush3.bf16.msra.mxu0 (!%p2017_p5), %v2375_v52  ;;  %v1382_v7 = vld [vmem:[%s2876_s10 + $0x68] sm:$0xff] (!%p2017_p5)  ;;  %v1384_v10 = vld [vmem:[%s2876_s10 + $0x78] sm:$0xff] (!%p2017_p5) }
 0x27e   : > { %v1250_v13 = vmax.f32 %v2421_v9, 0.0  ;;  %2380 = vmatprep.subr.bf16.mxu0 (!%p2017_p5), %v2379_v57  ;;  %v2387_v8 = vpack.c.bf16 (!%p2017_p5), %v1382_v7, %v1381_v6  ;;  %v1383_v9 = vld [vmem:[%s2876_s10 + $0x70] sm:$0xff] (!%p2017_p5) }
 0x27f   : > { %v1248_v20 = vmax.f32 %v2422_v11, 0.0  ;;  %v2391_v11 = vpack.c.bf16 (!%p2017_p5), %v1384_v10, %v1383_v9 }
 0x280   : > { %v1258_v22 = vpack.c.bf16 %v1250_v13, %v1249_v12  ;;  %2259 = vmatpush3.bf16.msra.mxu1 %v1256_v61  ;;  %v1380_v61 = vld [vmem:[%s2876_s10 + $0x58] sm:$0xff] (!%p2017_p5) }
 0x281   : > { %v1257_v14 = vpack.c.bf16 %v1248_v20, %v1247_v15  ;;  %v2383_v1 = vpack.c.bf16 (!%p2017_p5), %v1380_v61, %v1379_v60  ;;  %2382 = vmatpush3.bf16.msra.mxu0 (!%p2017_p5), %v2379_v57 }
 0x283   : > { %2260 = vmatprep.subr.bf16.mxu1 %v1257_v14  ;;  %2384 = vmatprep.subr.bf16.mxu0 (!%p2017_p5), %v2383_v1 }
 0x284   : > { %2261 = vmatpush3.bf16.msra.mxu1 %v1257_v14 }
 0x285   : > { %2262 = vmatprep.subr.bf16.mxu1 %v1258_v22  ;;  %2386 = vmatpush3.bf16.msra.mxu0 (!%p2017_p5), %v2383_v1 }
 0x286   : > { %2388 = vmatprep.subr.bf16.mxu0 (!%p2017_p5), %v2387_v8 }
 0x288   : > { %2263 = vmatpush3.bf16.msra.mxu1 %v1258_v22 }
 0x289   : > { %2316 = vmatprep.subr.msk.mxu1 (!%p2017_p5), %vm1514_vm10, %v1360_v46  ;;  %2390 = vmatpush3.bf16.msra.mxu0 (!%p2017_p5), %v2387_v8 }
 0x28a   : > { %2392 = vmatprep.subr.bf16.mxu0 (!%p2017_p5), %v2391_v11 }
 0x28b   : > { %2265 = vmatmul.mubr.msk.bf16.vlgmr.msra.gmra.mrb[16].mxu1 %vm2654_vm0, %v2475_v63 }
 0x28c   : > { %2268 = vmatprep.mubr.msk.bf16.mxu1 %vm2013_vm7, %v2475_v63  ;;  %2317 = vmatpush3.msk.msra.mxu1 (!%p2017_p5), %vm1514_vm10, %v1360_v46 }
 0x28d   : > { %2394 = vmatpush3.bf16.msra.mxu0 (!%p2017_p5), %v2391_v11 }
 0x293   : > { %2269 = vmatmul.mubr.msk.bf16.gmra.mrb[20].mxu1 %vm2015_vm8, %v2475_v63  ;;  %v1266_v63 = vld [vmem:[#allocation5 + $0x38] sm:$0xff] }
 0x294   : > { %2318 = vmatprep.mubr.msk.f32.mxu1 (!%p2017_p5), %vm1093_vm6, %v1352_v47 }
 0x29b   : > { %2319 = vmatmul.mubr.msk.f32.vlgmr.msra.gmra.mrb[0].mxu1 (!%p2017_p5), %vm1093_vm6, %v1353_v50 }
 0x29c   : > { %2321 = vmatprep.mubr.msk.f32.mxu1 (!%p2017_p5), %vm1093_vm6, %v1354_v51 }
 0x29f   : > { %2322 = vmatmul.mubr.msk.f32.gmra.mrb[2].mxu1 (!%p2017_p5), %vm1093_vm6, %v1355_v53 }
 0x2a0   : > { %2324 = vmatprep.mubr.msk.f32.mxu1 (!%p2017_p5), %vm1093_vm6, %v1356_v56 }
 0x2a3   : > { %2325 = vmatmul.mubr.msk.f32.gmra.mrb[4].mxu1 (!%p2017_p5), %vm1093_vm6, %v1357_v59 }
 0x2a4   : > { %2327 = vmatprep.mubr.msk.f32.mxu1 (!%p2017_p5), %vm1093_vm6, %v1358_v0 }
 0x2a7   : > { %2328 = vmatmul.mubr.msk.f32.gmra.mrb[6].mxu1 (!%p2017_p5), %vm1093_vm6, %v1359_v5 }
 0x35e   : > { %v2266_v17 = vpop.f32.mrb[16].mxu1 }
 0x35f   : > { %v1334_v18 = vadd.f32 %v2266_v17, %v1261_v58  ;;  %v1301_v21 = vpop.f32.mrb[17].mxu1  ;;  %v2478_v17 = vmov (!%p2017_p5), 0.0  }
 0x360   : > { %v1332_v19 = vadd.f32 %v1301_v21, %v1259_v16  ;;  %v2267_v24 = vpop.f32.mrb[18].mxu1  ;;  %v2476_v16 = vmov (!%p2017_p5), 0.0|0.0   ;;  %2346 = vmatprep.mubr.msk.f32.mxu1 (!%p2017_p5), %vm2477_vm11, %v2478_v17  ;;  %v1638_v21 = vld [vmem:[%s2869_s3] sm:$0x1] (!%p2017_p5) }
 0x361   : > { %1342 = vst [vmem:[#allocation5 + $0x10] sm:$0xff] %v1334_v18  ;;  %v1335_v25 = vadd.f32 %v2267_v24, %v1262_v62  ;;  %v1304_v26 = vpop.f32.mrb[19].mxu1  ;;  %2395 = vmatprep.subr.bf16.mxu1 (!%p2017_p5), %v2476_v16  ;;  %v1713_v62 = vld [vmem:[%s2870_s4] sm:$0x3] (!%p2017_p5)  ;;  %v2479_v18 = vmov (!%p2017_p5), 0  }
 0x362   : > { %1340 = vst [vmem:[#allocation5] sm:$0xff] %v1332_v19  ;;  %v1333_v2 = vadd.f32 %v1304_v26, %v1260_v23  ;;  %2464 = vset.pattern.permute.xlu0 (!%p2017_p5), %v2479_v18  ;;  %v1639_v23 = vunpack.c.l.bf16 (!%p2017_p5), %v1638_v21 }
 0x363   : > { %1343 = vst [vmem:[#allocation5 + $0x18] sm:$0xff] %v1335_v25  ;;  %1716 = vperm.xlu0 (!%p2017_p5), %2464, %v1713_v62  }
 0x364   : > { %1341 = vst [vmem:[#allocation5 + $0x8] sm:$0xff] %v1333_v2 }
 0x366   : > { %v2270_v27 = vpop.f32.mrb[20].mxu1  ;;  %1351 = sbr.rel (%p2017_p5) target bundleno = 1554 (0x612), region = 76 }
 0x367   : > { %v1338_v28 = vadd.f32 %v2270_v27, %v1265_v3  ;;  %v1317_v29 = vpop.f32.mrb[21].mxu1 }
 0x368   : > { %v1336_v31 = vadd.f32 %v1317_v29, %v1263_v4  ;;  %v2271_v32 = vpop.f32.mrb[22].mxu1  ;;  %v1363_v13 = vld [vmem:[#allocation5 + $0x10] sm:$0xff] (!%p2017_p5) }
 0x369   : > { %1346 = vst [vmem:[#allocation5 + $0x30] sm:$0xff] %v1338_v28  ;;  %v1339_v33 = vadd.f32 %v2271_v32, %v1266_v63  ;;  %v1320_v34 = vpop.f32.mrb[23].mxu1  ;;  %v1361_v49 = vld [vmem:[#allocation5] sm:$0xff] (!%p2017_p5) }
 0x36a   : > { %1344 = vst [vmem:[#allocation5 + $0x20] sm:$0xff] %v1336_v31  ;;  %v1337_v35 = vadd.f32 %v1320_v34, %v1264_v30  ;;  %2304 = vmatprep.mubr.f32.mxu0 (!%p2017_p5), %v1361_v49  ;;  %v1364_v15 = vld [vmem:[#allocation5 + $0x18] sm:$0xff] (!%p2017_p5)  ;;  %v2027_v28 = vld [vmem:[%s2877_s11] ss:$0 sm:$0xff] (!%p2017_p5) }
 0x36b   : > { %1347 = vst [vmem:[#allocation5 + $0x38] sm:$0xff] %v1339_v33  ;;  %v1362_v12 = vld [vmem:[#allocation5 + $0x8] sm:$0xff] (!%p2017_p5) }
 0x36c   : > { %1345 = vst [vmem:[#allocation5 + $0x28] sm:$0xff] %v1337_v35  ;;  %2305 = vmatmul.mubr.f32.vlgmr.msra.gmra.mrb[0].mxu0 (!%p2017_p5), %v1362_v12 }
 0x36d   : > { %2307 = vmatprep.mubr.f32.mxu0 %v1363_v13 }
 0x36e   : > { %v2320_v19 = vpop.f32.mrb[0].mxu1 }
 0x36f   : > { %v1584_v24 = vpop.f32.mrb[1].mxu1 }
 0x370   : > { %2308 = vmatmul.mubr.f32.gmra.mrb[2].mxu0 %v1364_v15  ;;  %v1367_v14 = vld [vmem:[#allocation5 + $0x30] sm:$0xff] }
 0x371   : > { %v1365_v20 = vld [vmem:[#allocation5 + $0x20] sm:$0xff] }
 0x372   : > { %2310 = vmatprep.mubr.f32.mxu0 %v1365_v20  ;;  %v1368_v58 = vld [vmem:[#allocation5 + $0x38] sm:$0xff]  ;;  %v2323_v25 = vpop.f32.mrb[2].mxu1 }
 0x373   : > { %v1366_v22 = vld [vmem:[#allocation5 + $0x28] sm:$0xff]  ;;  %v1594_v26 = vpop.f32.mrb[3].mxu1 }
 0x374   : > { %2311 = vmatmul.mubr.f32.gmra.mrb[4].mxu0 %v1366_v22 }
 0x375   : > { %2313 = vmatprep.mubr.f32.mxu0 %v1367_v14 }
 0x376   : > { %v2326_v2 = vpop.f32.mrb[4].mxu1 }
 0x377   : > { %v1604_v3 = vpop.f32.mrb[5].mxu1 }
 0x378   : > { %2314 = vmatmul.mubr.f32.gmra.mrb[6].mxu0 %v1368_v58 }
 0x37a   : > { %v2329_v4 = vpop.f32.mrb[6].mxu1 }
 0x37b   : > { %v1614_v27 = vpop.f32.mrb[7].mxu1 }
 0x381   : > { %1720 = vxpose.xlu0.b32.start.end [1/1] (short) (narrow) %v1639_v23, 64 }
 0x3e2   : > { %v1717_v56 = vpop.permute.xlu0 %1716 }
 0x401   : > { %v1736_v57 = vpop.trf.xlu0 }
 0x405   : > { %v1737_v59 = vpop.trf.xlu0 }
 0x409   : > { %v1738_v60 = vpop.trf.xlu0 }
 0x40d   : > { %v1739_v61 = vpop.trf.xlu0 }
 0x411   : > { %v1740_v0 = vpop.trf.xlu0 }
 0x415   : > { %v1741_v7 = vpop.trf.xlu0 }
 0x419   : > { %v1742_v8 = vpop.trf.xlu0 }
 0x41d   : > { %v1743_v9 = vpop.trf.xlu0 }
 0x43f   : > { %v2306_v63 = vpop.f32.mrb[0].mxu0 }
 0x440   : > { %v1590_v29 = vadd.f32 %v2320_v19, %v2306_v63  ;;  %v1451_v30 = vpop.f32.mrb[1].mxu0 }
 0x441   : > { %v1585_v31 = vadd.f32 %v1584_v24, %v1451_v30 }
 0x442   : > { %v1631_v32 = vadd.f32 %v2027_v28, %v1590_v29 }
 0x443   : > { %v1630_v33 = vadd.f32 %v2027_v28, %v1585_v31  ;;  %v2309_v34 = vpop.f32.mrb[2].mxu0 }
 0x444   : > { %v1600_v35 = vadd.f32 %v2323_v25, %v2309_v34  ;;  %v1461_v36 = vpop.f32.mrb[3].mxu0 }
 0x445   : > { %v2396_v37 = vpack.c.bf16 %v1631_v32, %v1630_v33  ;;  %v1595_v38 = vadd.f32 %v1594_v26, %v1461_v36 }
 0x446   : > { %v1633_v39 = vadd.f32 %v2027_v28, %v1600_v35 }
 0x447   : > { %v1632_v40 = vadd.f32 %v2027_v28, %v1595_v38  ;;  %v2312_v41 = vpop.f32.mrb[4].mxu0  ;;  %2397 = vmatpush3.bf16.msra.mxu1 %v2396_v37 }
 0x448   : > { %v1610_v42 = vadd.f32 %v2326_v2, %v2312_v41  ;;  %v1471_v43 = vpop.f32.mrb[5].mxu0  ;;  %2398 = vmatprep.subr.bf16.mxu1 %v2476_v16 }
 0x449   : > { %v2399_v44 = vpack.c.bf16 %v1633_v39, %v1632_v40  ;;  %v1605_v45 = vadd.f32 %v1604_v3, %v1471_v43 }
 0x44a   : > { %v1635_v46 = vadd.f32 %v2027_v28, %v1610_v42 }
 0x44b   : > { %v1634_v47 = vadd.f32 %v2027_v28, %v1605_v45  ;;  %v2315_v48 = vpop.f32.mrb[6].mxu0  ;;  %2400 = vmatpush3.bf16.msra.mxu1 %v2399_v44 }
 0x44c   : > { %v1620_v49 = vadd.f32 %v2329_v4, %v2315_v48  ;;  %v1481_v50 = vpop.f32.mrb[7].mxu0  ;;  %2401 = vmatprep.subr.bf16.mxu1 %v2476_v16 }
 0x44d   : > { %v2402_v51 = vpack.c.bf16 %v1635_v46, %v1634_v47  ;;  %v1615_v52 = vadd.f32 %v1614_v27, %v1481_v50 }
 0x44e   : > { %v1637_v53 = vadd.f32 %v2027_v28, %v1620_v49 }
 0x44f   : > { %v1636_v54 = vadd.f32 %v2027_v28, %v1615_v52  ;;  %2403 = vmatpush3.bf16.msra.mxu1 %v2402_v51 }
 0x450   : > { %2404 = vmatprep.subr.bf16.mxu1 %v2476_v16 }
 0x451   : > { %v2405_v55 = vpack.c.bf16 %v1637_v53, %v1636_v54 }
 0x453   : > { %2406 = vmatpush3.bf16.msra.mxu1 %v2405_v55 }
 0x456   : > { %2347 = vmatmul.mubr.msk.f32.vlgmr.msra.gmra.mrb[8].mxu1 %vm816_vm5, %v1639_v23 }
 0x457   : > { %2351 = vmatprep.mubr.msk.f32.mxu1 %vm1752_vm12, %v1736_v57 }
 0x529   : > { %v1709_v1 = vpop.f32.mrb[8].mxu1 }
 0x52a   : > { %v1719_v5 = vmul.f32 %v1717_v56, %v1709_v1  ;;  %v2348_v6 = vpop.f32.mrb[9].mxu1 }
 0x52c   : > { %2349 = vmatprep.subr.msk.mxu1 %vm1118_vm9, %v1719_v5 }
 0x52d   : > { %2350 = vmatpush3.msk.msra.mxu1 %vm1118_vm9, %v1719_v5 }
 0x52e   : > { %2352 = vmatmul.mubr.msk.f32.vlgmr.msra.gmra.mrb[10].mxu1 %vm1752_vm12, %v1737_v59 }
 0x52f   : > { %2354 = vmatprep.mubr.msk.f32.mxu1 %vm1752_vm12, %v1738_v60 }
 0x532   : > { %2355 = vmatmul.mubr.msk.f32.gmra.mrb[12].mxu1 %vm1752_vm12, %v1739_v61 }
 0x533   : > { %2357 = vmatprep.mubr.msk.f32.mxu1 %vm1752_vm12, %v1740_v0 }
 0x536   : > { %2358 = vmatmul.mubr.msk.f32.gmra.mrb[14].mxu1 %vm1752_vm12, %v1741_v7 }
 0x537   : > { %2360 = vmatprep.mubr.msk.f32.mxu1 %vm1752_vm12, %v1742_v8 }
 0x53a   : > { %2361 = vmatmul.mubr.msk.f32.gmra.mrb[16].mxu1 %vm1752_vm12, %v1743_v9 }
 0x601   : > { %v2353_v10 = vpop.f32.mrb[10].mxu1 }
 0x602   : > { %v1886_v11 = vsub.f32 %v1631_v32, %v2353_v10  ;;  %v1846_v12 = vpop.f32.mrb[11].mxu1 }
 0x603   : > { %v1885_v13 = vsub.f32 %v1630_v33, %v1846_v12 }
 0x604   : > { %1894 = vst [vmem:[%s2878_s12 + $0x8] sm:$0xff] %v1886_v11 }
 0x605   : > { %1893 = vst [vmem:[%s2878_s12] sm:$0xff] %v1885_v13  ;;  %v2356_v15 = vpop.f32.mrb[12].mxu1 }
 0x606   : > { %v1888_v20 = vsub.f32 %v1633_v39, %v2356_v15  ;;  %v1856_v22 = vpop.f32.mrb[13].mxu1 }
 0x607   : > { %v1887_v14 = vsub.f32 %v1632_v40, %v1856_v22 }
 0x608   : > { %1896 = vst [vmem:[%s2878_s12 + $0x18] sm:$0xff] %v1888_v20 }
 0x609   : > { %1895 = vst [vmem:[%s2878_s12 + $0x10] sm:$0xff] %v1887_v14  ;;  %v2359_v58 = vpop.f32.mrb[14].mxu1 }
 0x60a   : > { %v1890_v16 = vsub.f32 %v1635_v46, %v2359_v58  ;;  %v1866_v17 = vpop.f32.mrb[15].mxu1 }
 0x60b   : > { %v1889_v62 = vsub.f32 %v1634_v47, %v1866_v17 }
 0x60c   : > { %1898 = vst [vmem:[%s2878_s12 + $0x28] sm:$0xff] %v1890_v16 }
 0x60d   : > { %1897 = vst [vmem:[%s2878_s12 + $0x20] sm:$0xff] %v1889_v62  ;;  %v2362_v18 = vpop.f32.mrb[16].mxu1 }
 0x60e   : > { %v1892_v21 = vsub.f32 %v1637_v53, %v2362_v18  ;;  %v1876_v23 = vpop.f32.mrb[17].mxu1 }
 0x60f   : > { %v1891_v19 = vsub.f32 %v1636_v54, %v1876_v23 }
 0x610   : > { %1900 = vst [vmem:[%s2878_s12 + $0x38] sm:$0xff] %v1892_v21 }
 0x611   : > { %1899 = vst [vmem:[%s2878_s12 + $0x30] sm:$0xff] %v1891_v19 }
 0x612 PF: > { %s22_s21 = sadd.s32 1, %s2471_s21  }
 0x613   : > { %p19_p6 = scmp.ge.s32.totalorder %s22_s21, 4  }
 0x615   :  { %21 = sbr.rel (!%p19_p6) target bundleno = 1 (0x1), region = 105 }

</bundles_post_ra>
